<compile_context>
chip_gen: v5e
topology: v5e:2x2
jax: 0.10.0
libtpu: 0.0.40
codegen_flags: <defaults>
</compile_context>

<pallas_src>
import functools

import jax
import jax.numpy as jnp
from jax import lax
from jax.experimental import pallas as pl
from jax.experimental.pallas import tpu as pltpu

_VMEM = pl.BlockSpec(memory_space=pltpu.MemorySpace.VMEM)
_SMEM = pl.BlockSpec(memory_space=pltpu.MemorySpace.SMEM)
_F32 = jnp.float32


def _eye(k):
    row = lax.broadcasted_iota(jnp.int32, (k, k), 0)
    col = lax.broadcasted_iota(jnp.int32, (k, k), 1)
    return (row == col).astype(_F32)


def _row_dot(row, mat):
    """(1, d) x (k, d) -> (1, k): projection laid out along lanes."""
    return lax.dot_general(row, mat, (((1,), (1,)), ((), ())),
                           preferred_element_type=_F32)


def _cosine_mean(a, b):
    """mean_i cosine_similarity(a_i, b_i) with per-norm eps clamp -> (1, 1)."""
    dot = jnp.sum(a * b, axis=1, keepdims=True)
    na = jnp.sqrt(jnp.sum(a * a, axis=1, keepdims=True))
    nb = jnp.sqrt(jnp.sum(b * b, axis=1, keepdims=True))
    cos = dot / (jnp.maximum(na, 1e-8) * jnp.maximum(nb, 1e-8))
    return jnp.sum(cos, axis=0, keepdims=True) * (1.0 / a.shape[0])


def _fused_forward_kernel(protos_ref, meta_v_ref, meta_buf_ref,
                          adj_w_ref, gate_w_ref, gcn_w_ref, gcn_b_ref,
                          bias_ref, rep_ref, corr_ref, *, sigma):
    p = protos_ref[...]          # (m, d)
    v = meta_v_ref[...]          # (n, d)
    buf = meta_buf_ref[...]      # (n, d)
    adj_w = adj_w_ref[...]       # (1, d)   nn.Linear(hidden, 1).weight
    gate_w = gate_w_ref[...]     # (1, d)
    w_gcn = gcn_w_ref[...]       # (d, d)
    b_row = gcn_b_ref[...]       # (1, d)
    adj_b = bias_ref[0]          # SMEM scalars
    gate_b = bias_ref[1]

    m = p.shape[0]
    n = v.shape[0]
    d = p.shape[1]

    # ---- correlation_meta (uses the buffer *before* any update) ----------
    c_meta = _cosine_mean(buf, v)

    # ---- eye masks, hoisted and shared -----------------------------------
    eye_m = _eye(m)
    eye_n = _eye(n)

    # ---- pairwise MLP graphs: sigmoid((X_i - X_j)@w + b), diag forced to 1
    def pairwise_graph(x, w_row, bias, eye):
        proj_col = jnp.sum(x * w_row, axis=1, keepdims=True)   # (k,1) VPU+XLU
        proj_row = _row_dot(w_row, x)                          # (1,k)
        g = jax.nn.sigmoid(proj_col - proj_row + bias)
        return g * (1.0 - eye) + eye

    meta_graph = pairwise_graph(v, adj_w, adj_b, eye_n)        # (n,n)
    proto_graph = pairwise_graph(p, gate_w, gate_b, eye_m)     # (m,m)

    # ---- cross graph (both orientations; avoids in-kernel transpose) -----
    pp = p * p
    vv = v * v
    xx_col = jnp.sum(pp, axis=1, keepdims=True)                # (m,1)
    yy_col = jnp.sum(vv, axis=1, keepdims=True)                # (n,1)
    ones_row = jnp.ones((1, d), _F32)
    xx_row = _row_dot(ones_row, pp)                            # (1,m)
    yy_row = _row_dot(ones_row, vv)                            # (1,n)
    pv = lax.dot_general(p, v, (((1,), (1,)), ((), ())),
                         preferred_element_type=_F32)          # (m,n) = p @ v^T
    pvt = lax.dot_general(v, p, (((1,), (1,)), ((), ())),
                          preferred_element_type=_F32)         # (n,m) = v @ p^T

    inv_two_sigma = 1.0 / (2.0 * sigma)
    logits = -jnp.maximum(xx_col + yy_row - 2.0 * pv, 1e-6) * inv_two_sigma
    e = jnp.exp(logits - jnp.max(logits, axis=0, keepdims=True))
    cross = e / jnp.sum(e, axis=0, keepdims=True)              # softmax over protos

    logits_t = -jnp.maximum(yy_col + xx_row - 2.0 * pvt, 1e-6) * inv_two_sigma
    et = jnp.exp(logits_t - jnp.max(logits_t, axis=1, keepdims=True))
    cross_t = et / jnp.sum(et, axis=1, keepdims=True)          # == cross.T

    # ---- GCN on super_graph = [[proto_graph, cross],[cross^T, meta_graph]]
    # adj <- super_graph + I ; D^-1 adj ; tanh(adj @ (feature @ W) + b)
    a11 = proto_graph + eye_m
    a22 = meta_graph + eye_n
    rs_top = (jnp.sum(a11, axis=1, keepdims=True)
              + jnp.sum(cross, axis=1, keepdims=True))         # (m,1)
    rs_bot = (jnp.sum(cross_t, axis=1, keepdims=True)
              + jnp.sum(a22, axis=1, keepdims=True))           # (n,1)

    pre_p = jnp.dot(p, w_gcn, preferred_element_type=_F32)     # (m,d)
    pre_m = jnp.dot(v, w_gcn, preferred_element_type=_F32)     # (n,d)

    top = (jnp.dot(a11, pre_p, preferred_element_type=_F32)
           + jnp.dot(cross, pre_m, preferred_element_type=_F32))       # (m,d)
    bot = (jnp.dot(cross_t, pre_p, preferred_element_type=_F32)
           + jnp.dot(a22, pre_m, preferred_element_type=_F32))         # (n,d)

    # TODO(synk): GraphConvolution's Dropout(p=0.6) is omitted (eval-mode
    # semantics); training-mode dropout is stochastic and not reproduced here.
    rep_p = jnp.tanh(top / rs_top + b_row)                     # representation[:batch]
    rep_m = jnp.tanh(bot / rs_bot + b_row)                     # representation[batch:]

    rep_ref[...] = rep_p

    # ---- final correlations, packed into one (1, 3) output ---------------
    c_transfer = _cosine_mean(rep_m, v)
    c_protos = _cosine_mean(rep_p, p)

    lane = lax.broadcasted_iota(jnp.int32, (1, 3), 1)
    corr_ref[...] = (jnp.where(lane == 0, c_meta, 0.0)
                     + jnp.where(lane == 1, c_transfer, 0.0)
                     + jnp.where(lane == 2, c_protos, 0.0))


@functools.partial(jax.jit, static_argnames=("sigma",))
def meta_graph_fd_bn_forward(inputs, params, *, sigma=2.0):
    """Functional forward of MetaGraph_fd_bn (one fused Pallas kernel)."""
    protos = inputs.astype(_F32)
    meta_v = params["meta_graph_vertex"].astype(_F32)
    meta_buf = params["meta_graph_vertex_buffer"].astype(_F32)
    adj_w = jnp.reshape(params["adj_w"], (1, -1)).astype(_F32)
    gate_w = jnp.reshape(params["gate_w"], (1, -1)).astype(_F32)
    gcn_w = params["gcn_W"].astype(_F32)
    gcn_b = jnp.reshape(params["gcn_b"], (1, -1)).astype(_F32)
    biases = jnp.concatenate([jnp.reshape(params["adj_b"], (1,)),
                              jnp.reshape(params["gate_b"], (1,))]).astype(_F32)

    batch, d = protos.shape
    rep, corr = pl.pallas_call(
        functools.partial(_fused_forward_kernel, sigma=float(sigma)),
        out_shape=(jax.ShapeDtypeStruct((batch, d), _F32),
                   jax.ShapeDtypeStruct((1, 3), _F32)),
        in_specs=[_VMEM, _VMEM, _VMEM, _VMEM, _VMEM, _VMEM, _VMEM, _SMEM],
        out_specs=(_VMEM, _VMEM),
    )(protos, meta_v, meta_buf, adj_w, gate_w, gcn_w, gcn_b, biases)

    # TODO(synk): the PyTorch module mutates meta_graph_vertex_buffer in
    # forward(); in this functional API the caller updates the buffer.
    return rep, [corr[0, 0], corr[0, 1], corr[0, 2]]


# --------------------------------------------------------------------------
# Pure-JAX reference (mirrors the PyTorch module, eval mode) for validation.
# --------------------------------------------------------------------------
def _reference_forward(inputs, params, sigma=2.0):
    with jax.default_matmul_precision("highest"):
        protos = inputs.astype(_F32)
        mv = params["meta_graph_vertex"].astype(_F32)
        buf = params["meta_graph_vertex_buffer"].astype(_F32)
        w_adj = jnp.reshape(params["adj_w"], (-1,)).astype(_F32)
        w_gate = jnp.reshape(params["gate_w"], (-1,)).astype(_F32)
        b_adj = jnp.reshape(params["adj_b"], ()).astype(_F32)
        b_gate = jnp.reshape(params["gate_b"], ()).astype(_F32)
        w_gcn = params["gcn_W"].astype(_F32)
        b_gcn = params["gcn_b"].astype(_F32)
        batch = protos.shape[0]

        def cos_mean(a, b):
            na = jnp.sqrt(jnp.sum(a * a, axis=1))
            nb = jnp.sqrt(jnp.sum(b * b, axis=1))
            cos = jnp.sum(a * b, axis=1) / (jnp.maximum(na, 1e-8) * jnp.maximum(nb, 1e-8))
            return jnp.mean(cos)

        def pair_graph(x, w, b):
            k = x.shape[0]
            diff = x[:, None, :] - x[None, :, :]
            g = jax.nn.sigmoid(jnp.einsum("ijk,k->ij", diff, w) + b)
            eye = jnp.eye(k, dtype=_F32)
            return g * (1.0 - eye) + eye

        c_meta = cos_mean(buf, mv)
        mg = pair_graph(mv, w_adj, b_adj)
        pg = pair_graph(protos, w_gate, b_gate)

        xx = jnp.sum(protos ** 2, axis=1, keepdims=True)
        yy = jnp.sum(mv ** 2, axis=1, keepdims=True).T
        dist = jnp.maximum(xx + yy - 2.0 * protos @ mv.T, 1e-6)
        cross = jax.nn.softmax(-dist / (2.0 * sigma), axis=0)

        sg = jnp.block([[pg, cross], [cross.T, mg]])
        feat = jnp.concatenate([protos, mv], axis=0)
        adj = sg + jnp.eye(sg.shape[0], dtype=_F32)
        adj = adj / jnp.sum(adj, axis=1, keepdims=True)
        rep = jnp.tanh(adj @ (feat @ w_gcn) + b_gcn)

        c_tm = cos_mean(rep[batch:], mv)
        c_p = cos_mean(rep[:batch], protos)
        return rep[:batch], [c_meta, c_tm, c_p]


if __name__ == "__main__":
    import numpy as np

    key = jax.random.PRNGKey(0)
    batch = 4
    hidden_dim = 32          # GCN W is (hidden, hidden); must equal input_dim
    input_dim = 32
    meta_n = 8               # meta_graph_vertex_num (small synthetic size)

    k = jax.random.split(key, 8)
    params = {
        # nn.Parameter(torch.rand(meta_n, input_dim)) -> uniform [0, 1)
        "meta_graph_vertex": jax.random.uniform(k[0], (meta_n, input_dim), _F32),
        # register_buffer(torch.rand(...))
        "meta_graph_vertex_buffer": jax.random.uniform(k[1], (meta_n, input_dim), _F32),
        # adj_mlp: nn.Linear(hidden, 1).weight has shape (1, hidden); bias = 0.1
        "adj_w": jax.random.normal(k[2], (1, hidden_dim), _F32),
        "adj_b": jnp.array([0.1], _F32),
        # gate_mlp: nn.Linear(hidden, 1); bias = 0.1
        "gate_w": jax.random.normal(k[3], (1, hidden_dim), _F32),
        "gate_b": jnp.array([0.1], _F32),
        # GraphConvolution: W (hidden, hidden), b zeros
        "gcn_W": jax.random.normal(k[4], (hidden_dim, hidden_dim), _F32),
        "gcn_b": jnp.zeros((hidden_dim,), _F32),
    }

    x = jax.random.normal(k[5], (batch, input_dim), _F32)

    rep, corrs = meta_graph_fd_bn_forward(x, params, sigma=2.0)
    jax.block_until_ready(rep)
    for c in corrs:
        jax.block_until_ready(c)
    assert rep.shape == (batch, hidden_dim)

    # Numerical sanity check against the pure-JAX reference.
    rep_ref, corrs_ref = _reference_forward(x, params, sigma=2.0)
    np.testing.assert_allclose(np.asarray(rep), np.asarray(rep_ref),
                               rtol=5e-4, atol=5e-4)
    for c, cr in zip(corrs, corrs_ref):
        np.testing.assert_allclose(np.asarray(c), np.asarray(cr),
                                   rtol=5e-4, atol=5e-4)

    print("KERNEL_OK")
</pallas_src>

<mosaic_0001>
module attributes {stable_mosaic.version = 11 : i64} {
  func.func @_fused_forward_kernel(%arg0: memref<4x32xf32, #tpu.memory_space<vmem>>, %arg1: memref<8x32xf32, #tpu.memory_space<vmem>>, %arg2: memref<8x32xf32, #tpu.memory_space<vmem>>, %arg3: memref<1x32xf32, #tpu.memory_space<vmem>>, %arg4: memref<1x32xf32, #tpu.memory_space<vmem>>, %arg5: memref<32x32xf32, #tpu.memory_space<vmem>>, %arg6: memref<1x32xf32, #tpu.memory_space<vmem>>, %arg7: memref<2xf32, #tpu.memory_space<smem>>, %arg8: memref<4x32xf32, #tpu.memory_space<vmem>>, %arg9: memref<1x3xf32, #tpu.memory_space<vmem>>) attributes {dimension_semantics = [], scalar_prefetch = 0 : i64, scratch_operands = 0 : i64, tpu.core_type = #tpu.core_type<tc>} {
    %c0 = arith.constant 0 : index
    %c0_0 = arith.constant 0 : index
    %0 = vector.load %arg0[%c0, %c0_0] : memref<4x32xf32, #tpu.memory_space<vmem>>, vector<4x32xf32>
    %c0_1 = arith.constant 0 : index
    %c0_2 = arith.constant 0 : index
    %1 = vector.load %arg1[%c0_1, %c0_2] : memref<8x32xf32, #tpu.memory_space<vmem>>, vector<8x32xf32>
    %c0_3 = arith.constant 0 : index
    %c0_4 = arith.constant 0 : index
    %2 = vector.load %arg2[%c0_3, %c0_4] : memref<8x32xf32, #tpu.memory_space<vmem>>, vector<8x32xf32>
    %c0_5 = arith.constant 0 : index
    %c0_6 = arith.constant 0 : index
    %3 = vector.load %arg3[%c0_5, %c0_6] : memref<1x32xf32, #tpu.memory_space<vmem>>, vector<1x32xf32>
    %c0_7 = arith.constant 0 : index
    %c0_8 = arith.constant 0 : index
    %4 = vector.load %arg4[%c0_7, %c0_8] : memref<1x32xf32, #tpu.memory_space<vmem>>, vector<1x32xf32>
    %c0_9 = arith.constant 0 : index
    %c0_10 = arith.constant 0 : index
    %5 = vector.load %arg5[%c0_9, %c0_10] : memref<32x32xf32, #tpu.memory_space<vmem>>, vector<32x32xf32>
    %c0_11 = arith.constant 0 : index
    %c0_12 = arith.constant 0 : index
    %6 = vector.load %arg6[%c0_11, %c0_12] : memref<1x32xf32, #tpu.memory_space<vmem>>, vector<1x32xf32>
    %c0_13 = arith.constant 0 : index
    %7 = memref.load %arg7[%c0_13] : memref<2xf32, #tpu.memory_space<smem>>
    %c1 = arith.constant 1 : index
    %8 = memref.load %arg7[%c1] : memref<2xf32, #tpu.memory_space<smem>>
    %9 = arith.mulf %2, %1 : vector<8x32xf32>
    %cst = arith.constant dense<0.000000e+00> : vector<8xf32>
    %10 = vector.multi_reduction <add>, %9, %cst [1] : vector<8x32xf32> to vector<8xf32>
    %11 = vector.shape_cast %10 : vector<8xf32> to vector<8x1xf32>
    %12 = arith.mulf %2, %2 : vector<8x32xf32>
    %cst_14 = arith.constant dense<0.000000e+00> : vector<8xf32>
    %13 = vector.multi_reduction <add>, %12, %cst_14 [1] : vector<8x32xf32> to vector<8xf32>
    %14 = vector.shape_cast %13 : vector<8xf32> to vector<8x1xf32>
    %15 = math.sqrt %14 : vector<8x1xf32>
    %16 = arith.mulf %1, %1 : vector<8x32xf32>
    %cst_15 = arith.constant dense<0.000000e+00> : vector<8xf32>
    %17 = vector.multi_reduction <add>, %16, %cst_15 [1] : vector<8x32xf32> to vector<8xf32>
    %18 = vector.shape_cast %17 : vector<8xf32> to vector<8x1xf32>
    %19 = math.sqrt %18 : vector<8x1xf32>
    %cst_16 = arith.constant 9.99999993E-9 : f32
    %20 = vector.broadcast %cst_16 : f32 to vector<8x1xf32>
    %21 = arith.maximumf %15, %20 : vector<8x1xf32>
    %cst_17 = arith.constant 9.99999993E-9 : f32
    %22 = vector.broadcast %cst_17 : f32 to vector<8x1xf32>
    %23 = arith.maximumf %19, %22 : vector<8x1xf32>
    %24 = arith.mulf %21, %23 : vector<8x1xf32>
    %25 = arith.divf %11, %24 : vector<8x1xf32>
    %cst_18 = arith.constant dense<0.000000e+00> : vector<1xf32>
    %26 = vector.multi_reduction <add>, %25, %cst_18 [0] : vector<8x1xf32> to vector<1xf32>
    %27 = vector.shape_cast %26 : vector<1xf32> to vector<1x1xf32>
    %cst_19 = arith.constant 1.250000e-01 : f32
    %28 = vector.broadcast %cst_19 : f32 to vector<1x1xf32>
    %29 = arith.mulf %27, %28 : vector<1x1xf32>
    %30 = tpu.iota {dimensions = array<i32: 0>} : vector<4x4xi32>
    %31 = tpu.iota {dimensions = array<i32: 1>} : vector<4x4xi32>
    %32 = arith.cmpi eq, %30, %31 : vector<4x4xi32>
    %33 = arith.extui %32 : vector<4x4xi1> to vector<4x4xi32>
    %34 = arith.sitofp %33 : vector<4x4xi32> to vector<4x4xf32>
    %35 = tpu.iota {dimensions = array<i32: 0>} : vector<8x8xi32>
    %36 = tpu.iota {dimensions = array<i32: 1>} : vector<8x8xi32>
    %37 = arith.cmpi eq, %35, %36 : vector<8x8xi32>
    %38 = arith.extui %37 : vector<8x8xi1> to vector<8x8xi32>
    %39 = arith.sitofp %38 : vector<8x8xi32> to vector<8x8xf32>
    %40 = vector.broadcast %3 : vector<1x32xf32> to vector<8x32xf32>
    %41 = arith.mulf %1, %40 : vector<8x32xf32>
    %cst_20 = arith.constant dense<0.000000e+00> : vector<8xf32>
    %42 = vector.multi_reduction <add>, %41, %cst_20 [1] : vector<8x32xf32> to vector<8xf32>
    %43 = vector.shape_cast %42 : vector<8xf32> to vector<8x1xf32>
    %cst_21 = arith.constant dense<0.000000e+00> : vector<1x8xf32>
    %44 = tpu.matmul %3, %1, %cst_21 {dimension_numbers = #tpu.dot_dimension_numbers<[1], [1], [0], [0], [0, 0, 1, 0], [], []>} : vector<1x32xf32>, vector<8x32xf32>, vector<1x8xf32> -> vector<1x8xf32>
    %45 = vector.broadcast %43 : vector<8x1xf32> to vector<8x8xf32>
    %46 = vector.broadcast %44 : vector<1x8xf32> to vector<8x8xf32>
    %47 = arith.subf %45, %46 : vector<8x8xf32>
    %48 = vector.broadcast %7 : f32 to vector<8x8xf32>
    %49 = arith.addf %47, %48 : vector<8x8xf32>
    %50 = arith.negf %49 : vector<8x8xf32>
    %51 = math.exp %50 : vector<8x8xf32>
    %cst_22 = arith.constant 1.000000e+00 : f32
    %52 = vector.broadcast %cst_22 : f32 to vector<8x8xf32>
    %53 = arith.addf %52, %51 : vector<8x8xf32>
    %54 = arith.divf %52, %53 : vector<8x8xf32>
    %cst_23 = arith.constant 1.000000e+00 : f32
    %55 = vector.broadcast %cst_23 : f32 to vector<8x8xf32>
    %56 = arith.subf %55, %39 : vector<8x8xf32>
    %57 = arith.mulf %54, %56 : vector<8x8xf32>
    %58 = arith.addf %57, %39 : vector<8x8xf32>
    %59 = vector.broadcast %4 : vector<1x32xf32> to vector<4x32xf32>
    %60 = arith.mulf %0, %59 : vector<4x32xf32>
    %cst_24 = arith.constant dense<0.000000e+00> : vector<4xf32>
    %61 = vector.multi_reduction <add>, %60, %cst_24 [1] : vector<4x32xf32> to vector<4xf32>
    %62 = vector.shape_cast %61 : vector<4xf32> to vector<4x1xf32>
    %cst_25 = arith.constant dense<0.000000e+00> : vector<1x4xf32>
    %63 = tpu.matmul %4, %0, %cst_25 {dimension_numbers = #tpu.dot_dimension_numbers<[1], [1], [0], [0], [0, 0, 1, 0], [], []>} : vector<1x32xf32>, vector<4x32xf32>, vector<1x4xf32> -> vector<1x4xf32>
    %64 = vector.broadcast %62 : vector<4x1xf32> to vector<4x4xf32>
    %65 = vector.broadcast %63 : vector<1x4xf32> to vector<4x4xf32>
    %66 = arith.subf %64, %65 : vector<4x4xf32>
    %67 = vector.broadcast %8 : f32 to vector<4x4xf32>
    %68 = arith.addf %66, %67 : vector<4x4xf32>
    %69 = arith.negf %68 : vector<4x4xf32>
    %70 = math.exp %69 : vector<4x4xf32>
    %cst_26 = arith.constant 1.000000e+00 : f32
    %71 = vector.broadcast %cst_26 : f32 to vector<4x4xf32>
    %72 = arith.addf %71, %70 : vector<4x4xf32>
    %73 = arith.divf %71, %72 : vector<4x4xf32>
    %cst_27 = arith.constant 1.000000e+00 : f32
    %74 = vector.broadcast %cst_27 : f32 to vector<4x4xf32>
    %75 = arith.subf %74, %34 : vector<4x4xf32>
    %76 = arith.mulf %73, %75 : vector<4x4xf32>
    %77 = arith.addf %76, %34 : vector<4x4xf32>
    %78 = arith.mulf %0, %0 : vector<4x32xf32>
    %79 = arith.mulf %1, %1 : vector<8x32xf32>
    %cst_28 = arith.constant dense<0.000000e+00> : vector<4xf32>
    %80 = vector.multi_reduction <add>, %78, %cst_28 [1] : vector<4x32xf32> to vector<4xf32>
    %81 = vector.shape_cast %80 : vector<4xf32> to vector<4x1xf32>
    %cst_29 = arith.constant dense<0.000000e+00> : vector<8xf32>
    %82 = vector.multi_reduction <add>, %79, %cst_29 [1] : vector<8x32xf32> to vector<8xf32>
    %83 = vector.shape_cast %82 : vector<8xf32> to vector<8x1xf32>
    %cst_30 = arith.constant 1.000000e+00 : f32
    %84 = vector.broadcast %cst_30 : f32 to vector<1x32xf32>
    %cst_31 = arith.constant dense<0.000000e+00> : vector<1x4xf32>
    %85 = tpu.matmul %84, %78, %cst_31 {dimension_numbers = #tpu.dot_dimension_numbers<[1], [1], [0], [0], [0, 0, 1, 0], [], []>} : vector<1x32xf32>, vector<4x32xf32>, vector<1x4xf32> -> vector<1x4xf32>
    %cst_32 = arith.constant dense<0.000000e+00> : vector<1x8xf32>
    %86 = tpu.matmul %84, %79, %cst_32 {dimension_numbers = #tpu.dot_dimension_numbers<[1], [1], [0], [0], [0, 0, 1, 0], [], []>} : vector<1x32xf32>, vector<8x32xf32>, vector<1x8xf32> -> vector<1x8xf32>
    %cst_33 = arith.constant dense<0.000000e+00> : vector<4x8xf32>
    %87 = tpu.matmul %0, %1, %cst_33 {dimension_numbers = #tpu.dot_dimension_numbers<[1], [1], [0], [0], [0, 0, 1, 0], [], []>} : vector<4x32xf32>, vector<8x32xf32>, vector<4x8xf32> -> vector<4x8xf32>
    %cst_34 = arith.constant dense<0.000000e+00> : vector<8x4xf32>
    %88 = tpu.matmul %1, %0, %cst_34 {dimension_numbers = #tpu.dot_dimension_numbers<[1], [1], [0], [0], [0, 0, 1, 0], [], []>} : vector<8x32xf32>, vector<4x32xf32>, vector<8x4xf32> -> vector<8x4xf32>
    %89 = vector.broadcast %81 : vector<4x1xf32> to vector<4x8xf32>
    %90 = vector.broadcast %86 : vector<1x8xf32> to vector<4x8xf32>
    %91 = arith.addf %89, %90 : vector<4x8xf32>
    %cst_35 = arith.constant 2.000000e+00 : f32
    %92 = vector.broadcast %cst_35 : f32 to vector<4x8xf32>
    %93 = arith.mulf %92, %87 : vector<4x8xf32>
    %94 = arith.subf %91, %93 : vector<4x8xf32>
    %cst_36 = arith.constant 9.99999997E-7 : f32
    %95 = vector.broadcast %cst_36 : f32 to vector<4x8xf32>
    %96 = arith.maximumf %94, %95 : vector<4x8xf32>
    %cst_37 = arith.constant 0.000000e+00 : f32
    %97 = vector.broadcast %cst_37 : f32 to vector<4x8xf32>
    %98 = arith.subf %97, %96 : vector<4x8xf32>
    %cst_38 = arith.constant 2.500000e-01 : f32
    %99 = vector.broadcast %cst_38 : f32 to vector<4x8xf32>
    %100 = arith.mulf %98, %99 : vector<4x8xf32>
    %cst_39 = arith.constant dense<0xFF800000> : vector<8xf32>
    %101 = vector.multi_reduction <maximumf>, %100, %cst_39 [0] : vector<4x8xf32> to vector<8xf32>
    %102 = vector.shape_cast %101 : vector<8xf32> to vector<1x8xf32>
    %103 = vector.broadcast %102 : vector<1x8xf32> to vector<4x8xf32>
    %104 = arith.subf %100, %103 : vector<4x8xf32>
    %105 = math.exp %104 : vector<4x8xf32>
    %cst_40 = arith.constant dense<0.000000e+00> : vector<8xf32>
    %106 = vector.multi_reduction <add>, %105, %cst_40 [0] : vector<4x8xf32> to vector<8xf32>
    %107 = vector.shape_cast %106 : vector<8xf32> to vector<1x8xf32>
    %108 = vector.broadcast %107 : vector<1x8xf32> to vector<4x8xf32>
    %109 = arith.divf %105, %108 : vector<4x8xf32>
    %110 = vector.broadcast %83 : vector<8x1xf32> to vector<8x4xf32>
    %111 = vector.broadcast %85 : vector<1x4xf32> to vector<8x4xf32>
    %112 = arith.addf %110, %111 : vector<8x4xf32>
    %cst_41 = arith.constant 2.000000e+00 : f32
    %113 = vector.broadcast %cst_41 : f32 to vector<8x4xf32>
    %114 = arith.mulf %113, %88 : vector<8x4xf32>
    %115 = arith.subf %112, %114 : vector<8x4xf32>
    %cst_42 = arith.constant 9.99999997E-7 : f32
    %116 = vector.broadcast %cst_42 : f32 to vector<8x4xf32>
    %117 = arith.maximumf %115, %116 : vector<8x4xf32>
    %cst_43 = arith.constant 0.000000e+00 : f32
    %118 = vector.broadcast %cst_43 : f32 to vector<8x4xf32>
    %119 = arith.subf %118, %117 : vector<8x4xf32>
    %cst_44 = arith.constant 2.500000e-01 : f32
    %120 = vector.broadcast %cst_44 : f32 to vector<8x4xf32>
    %121 = arith.mulf %119, %120 : vector<8x4xf32>
    %cst_45 = arith.constant dense<0xFF800000> : vector<8xf32>
    %122 = vector.multi_reduction <maximumf>, %121, %cst_45 [1] : vector<8x4xf32> to vector<8xf32>
    %123 = vector.shape_cast %122 : vector<8xf32> to vector<8x1xf32>
    %124 = vector.broadcast %123 : vector<8x1xf32> to vector<8x4xf32>
    %125 = arith.subf %121, %124 : vector<8x4xf32>
    %126 = math.exp %125 : vector<8x4xf32>
    %cst_46 = arith.constant dense<0.000000e+00> : vector<8xf32>
    %127 = vector.multi_reduction <add>, %126, %cst_46 [1] : vector<8x4xf32> to vector<8xf32>
    %128 = vector.shape_cast %127 : vector<8xf32> to vector<8x1xf32>
    %129 = vector.broadcast %128 : vector<8x1xf32> to vector<8x4xf32>
    %130 = arith.divf %126, %129 : vector<8x4xf32>
    %131 = arith.addf %77, %34 : vector<4x4xf32>
    %132 = arith.addf %58, %39 : vector<8x8xf32>
    %cst_47 = arith.constant dense<0.000000e+00> : vector<4xf32>
    %133 = vector.multi_reduction <add>, %131, %cst_47 [1] : vector<4x4xf32> to vector<4xf32>
    %134 = vector.shape_cast %133 : vector<4xf32> to vector<4x1xf32>
    %cst_48 = arith.constant dense<0.000000e+00> : vector<4xf32>
    %135 = vector.multi_reduction <add>, %109, %cst_48 [1] : vector<4x8xf32> to vector<4xf32>
    %136 = vector.shape_cast %135 : vector<4xf32> to vector<4x1xf32>
    %137 = arith.addf %134, %136 : vector<4x1xf32>
    %cst_49 = arith.constant dense<0.000000e+00> : vector<8xf32>
    %138 = vector.multi_reduction <add>, %130, %cst_49 [1] : vector<8x4xf32> to vector<8xf32>
    %139 = vector.shape_cast %138 : vector<8xf32> to vector<8x1xf32>
    %cst_50 = arith.constant dense<0.000000e+00> : vector<8xf32>
    %140 = vector.multi_reduction <add>, %132, %cst_50 [1] : vector<8x8xf32> to vector<8xf32>
    %141 = vector.shape_cast %140 : vector<8xf32> to vector<8x1xf32>
    %142 = arith.addf %139, %141 : vector<8x1xf32>
    %cst_51 = arith.constant dense<0.000000e+00> : vector<4x32xf32>
    %143 = tpu.matmul %0, %5, %cst_51 {dimension_numbers = #tpu.dot_dimension_numbers<[1], [0], [0], [1], [0, 0, 1, 1], [], []>} : vector<4x32xf32>, vector<32x32xf32>, vector<4x32xf32> -> vector<4x32xf32>
    %cst_52 = arith.constant dense<0.000000e+00> : vector<8x32xf32>
    %144 = tpu.matmul %1, %5, %cst_52 {dimension_numbers = #tpu.dot_dimension_numbers<[1], [0], [0], [1], [0, 0, 1, 1], [], []>} : vector<8x32xf32>, vector<32x32xf32>, vector<8x32xf32> -> vector<8x32xf32>
    %cst_53 = arith.constant dense<0.000000e+00> : vector<4x32xf32>
    %145 = tpu.matmul %131, %143, %cst_53 {dimension_numbers = #tpu.dot_dimension_numbers<[1], [0], [0], [1], [0, 0, 1, 1], [], []>} : vector<4x4xf32>, vector<4x32xf32>, vector<4x32xf32> -> vector<4x32xf32>
    %cst_54 = arith.constant dense<0.000000e+00> : vector<4x32xf32>
    %146 = tpu.matmul %109, %144, %cst_54 {dimension_numbers = #tpu.dot_dimension_numbers<[1], [0], [0], [1], [0, 0, 1, 1], [], []>} : vector<4x8xf32>, vector<8x32xf32>, vector<4x32xf32> -> vector<4x32xf32>
    %147 = arith.addf %145, %146 : vector<4x32xf32>
    %cst_55 = arith.constant dense<0.000000e+00> : vector<8x32xf32>
    %148 = tpu.matmul %130, %143, %cst_55 {dimension_numbers = #tpu.dot_dimension_numbers<[1], [0], [0], [1], [0, 0, 1, 1], [], []>} : vector<8x4xf32>, vector<4x32xf32>, vector<8x32xf32> -> vector<8x32xf32>
    %cst_56 = arith.constant dense<0.000000e+00> : vector<8x32xf32>
    %149 = tpu.matmul %132, %144, %cst_56 {dimension_numbers = #tpu.dot_dimension_numbers<[1], [0], [0], [1], [0, 0, 1, 1], [], []>} : vector<8x8xf32>, vector<8x32xf32>, vector<8x32xf32> -> vector<8x32xf32>
    %150 = arith.addf %148, %149 : vector<8x32xf32>
    %151 = vector.broadcast %137 : vector<4x1xf32> to vector<4x32xf32>
    %152 = arith.divf %147, %151 : vector<4x32xf32>
    %153 = vector.broadcast %6 : vector<1x32xf32> to vector<4x32xf32>
    %154 = arith.addf %152, %153 : vector<4x32xf32>
    %155 = math.tanh %154 : vector<4x32xf32>
    %156 = vector.broadcast %142 : vector<8x1xf32> to vector<8x32xf32>
    %157 = arith.divf %150, %156 : vector<8x32xf32>
    %158 = vector.broadcast %6 : vector<1x32xf32> to vector<8x32xf32>
    %159 = arith.addf %157, %158 : vector<8x32xf32>
    %160 = math.tanh %159 : vector<8x32xf32>
    %c0_57 = arith.constant 0 : index
    %c0_58 = arith.constant 0 : index
    %161 = vector.load %arg8[%c0_57, %c0_58] : memref<4x32xf32, #tpu.memory_space<vmem>>, vector<4x32xf32>
    tpu.vector_store %arg8[%c0_57, %c0_58], %155 {strides = array<i32>} : memref<4x32xf32, #tpu.memory_space<vmem>>, vector<4x32xf32>,
    %162 = arith.mulf %160, %1 : vector<8x32xf32>
    %cst_59 = arith.constant dense<0.000000e+00> : vector<8xf32>
    %163 = vector.multi_reduction <add>, %162, %cst_59 [1] : vector<8x32xf32> to vector<8xf32>
    %164 = vector.shape_cast %163 : vector<8xf32> to vector<8x1xf32>
    %165 = arith.mulf %160, %160 : vector<8x32xf32>
    %cst_60 = arith.constant dense<0.000000e+00> : vector<8xf32>
    %166 = vector.multi_reduction <add>, %165, %cst_60 [1] : vector<8x32xf32> to vector<8xf32>
    %167 = vector.shape_cast %166 : vector<8xf32> to vector<8x1xf32>
    %168 = math.sqrt %167 : vector<8x1xf32>
    %169 = arith.mulf %1, %1 : vector<8x32xf32>
    %cst_61 = arith.constant dense<0.000000e+00> : vector<8xf32>
    %170 = vector.multi_reduction <add>, %169, %cst_61 [1] : vector<8x32xf32> to vector<8xf32>
    %171 = vector.shape_cast %170 : vector<8xf32> to vector<8x1xf32>
    %172 = math.sqrt %171 : vector<8x1xf32>
    %cst_62 = arith.constant 9.99999993E-9 : f32
    %173 = vector.broadcast %cst_62 : f32 to vector<8x1xf32>
    %174 = arith.maximumf %168, %173 : vector<8x1xf32>
    %cst_63 = arith.constant 9.99999993E-9 : f32
    %175 = vector.broadcast %cst_63 : f32 to vector<8x1xf32>
    %176 = arith.maximumf %172, %175 : vector<8x1xf32>
    %177 = arith.mulf %174, %176 : vector<8x1xf32>
    %178 = arith.divf %164, %177 : vector<8x1xf32>
    %cst_64 = arith.constant dense<0.000000e+00> : vector<1xf32>
    %179 = vector.multi_reduction <add>, %178, %cst_64 [0] : vector<8x1xf32> to vector<1xf32>
    %180 = vector.shape_cast %179 : vector<1xf32> to vector<1x1xf32>
    %cst_65 = arith.constant 1.250000e-01 : f32
    %181 = vector.broadcast %cst_65 : f32 to vector<1x1xf32>
    %182 = arith.mulf %180, %181 : vector<1x1xf32>
    %183 = arith.mulf %155, %0 : vector<4x32xf32>
    %cst_66 = arith.constant dense<0.000000e+00> : vector<4xf32>
    %184 = vector.multi_reduction <add>, %183, %cst_66 [1] : vector<4x32xf32> to vector<4xf32>
    %185 = vector.shape_cast %184 : vector<4xf32> to vector<4x1xf32>
    %186 = arith.mulf %155, %155 : vector<4x32xf32>
    %cst_67 = arith.constant dense<0.000000e+00> : vector<4xf32>
    %187 = vector.multi_reduction <add>, %186, %cst_67 [1] : vector<4x32xf32> to vector<4xf32>
    %188 = vector.shape_cast %187 : vector<4xf32> to vector<4x1xf32>
    %189 = math.sqrt %188 : vector<4x1xf32>
    %190 = arith.mulf %0, %0 : vector<4x32xf32>
    %cst_68 = arith.constant dense<0.000000e+00> : vector<4xf32>
    %191 = vector.multi_reduction <add>, %190, %cst_68 [1] : vector<4x32xf32> to vector<4xf32>
    %192 = vector.shape_cast %191 : vector<4xf32> to vector<4x1xf32>
    %193 = math.sqrt %192 : vector<4x1xf32>
    %cst_69 = arith.constant 9.99999993E-9 : f32
    %194 = vector.broadcast %cst_69 : f32 to vector<4x1xf32>
    %195 = arith.maximumf %189, %194 : vector<4x1xf32>
    %cst_70 = arith.constant 9.99999993E-9 : f32
    %196 = vector.broadcast %cst_70 : f32 to vector<4x1xf32>
    %197 = arith.maximumf %193, %196 : vector<4x1xf32>
    %198 = arith.mulf %195, %197 : vector<4x1xf32>
    %199 = arith.divf %185, %198 : vector<4x1xf32>
    %cst_71 = arith.constant dense<0.000000e+00> : vector<1xf32>
    %200 = vector.multi_reduction <add>, %199, %cst_71 [0] : vector<4x1xf32> to vector<1xf32>
    %201 = vector.shape_cast %200 : vector<1xf32> to vector<1x1xf32>
    %cst_72 = arith.constant 2.500000e-01 : f32
    %202 = vector.broadcast %cst_72 : f32 to vector<1x1xf32>
    %203 = arith.mulf %201, %202 : vector<1x1xf32>
    %204 = tpu.iota {dimensions = array<i32: 1>} : vector<1x3xi32>
    %c0_i32 = arith.constant 0 : i32
    %205 = vector.broadcast %c0_i32 : i32 to vector<1x3xi32>
    %206 = arith.cmpi eq, %204, %205 : vector<1x3xi32>
    %cst_73 = arith.constant 0.000000e+00 : f32
    %207 = vector.shape_cast %29 : vector<1x1xf32> to vector<1x1xf32>
    %208 = vector.broadcast %207 : vector<1x1xf32> to vector<1x3xf32>
    %209 = vector.broadcast %cst_73 : f32 to vector<1x3xf32>
    %210 = arith.select %206, %208, %209 : vector<1x3xi1>, vector<1x3xf32>
    %c1_i32 = arith.constant 1 : i32
    %211 = vector.broadcast %c1_i32 : i32 to vector<1x3xi32>
    %212 = arith.cmpi eq, %204, %211 : vector<1x3xi32>
    %cst_74 = arith.constant 0.000000e+00 : f32
    %213 = vector.shape_cast %182 : vector<1x1xf32> to vector<1x1xf32>
    %214 = vector.broadcast %213 : vector<1x1xf32> to vector<1x3xf32>
    %215 = vector.broadcast %cst_74 : f32 to vector<1x3xf32>
    %216 = arith.select %212, %214, %215 : vector<1x3xi1>, vector<1x3xf32>
    %217 = arith.addf %210, %216 : vector<1x3xf32>
    %c2_i32 = arith.constant 2 : i32
    %218 = vector.broadcast %c2_i32 : i32 to vector<1x3xi32>
    %219 = arith.cmpi eq, %204, %218 : vector<1x3xi32>
    %cst_75 = arith.constant 0.000000e+00 : f32
    %220 = vector.shape_cast %203 : vector<1x1xf32> to vector<1x1xf32>
    %221 = vector.broadcast %220 : vector<1x1xf32> to vector<1x3xf32>
    %222 = vector.broadcast %cst_75 : f32 to vector<1x3xf32>
    %223 = arith.select %219, %221, %222 : vector<1x3xi1>, vector<1x3xf32>
    %224 = arith.addf %217, %223 : vector<1x3xf32>
    %c0_76 = arith.constant 0 : index
    %c0_77 = arith.constant 0 : index
    %225 = vector.load %arg9[%c0_76, %c0_77] : memref<1x3xf32, #tpu.memory_space<vmem>>, vector<1x3xf32>
    tpu.vector_store %arg9[%c0_76, %c0_77], %224 {strides = array<i32>} : memref<1x3xf32, #tpu.memory_space<vmem>>, vector<1x3xf32>,
    return
  }
}

</mosaic_0001>

<bundles_post_ra>
// kernel: meta_graph_fd_bn_forward.1
= control target key start
LH: loop header
LB: loop body
LE: loop exit
PB: predicated region body
PF: predicated region fallthrough
CT: control target
= control target key end

     0   :  { %15 = vsyncpa [#allocation3], 0  ;;  %s1231_s0 = inlined_call_operand.vmem [shape: f32[4,32], index: 0, kind: input, shape index: {}]   ;;  %s1232_s1 = inlined_call_operand.vmem [shape: f32[8,32], index: 1, kind: input, shape index: {}]   ;;  %s1233_s2 = inlined_call_operand.hbm [shape: f32[8,32], index: 2, kind: input, shape index: {}]   ;;  %s1234_s3 = inlined_call_operand.hbm [shape: f32[1,32], index: 3, kind: input, shape index: {}]   ;;  %s1235_s4 = inlined_call_operand.hbm [shape: f32[1,32], index: 4, kind: input, shape index: {}]   ;;  %s1236_s5 = inlined_call_operand.hbm [shape: f32[32,32], index: 5, kind: input, shape index: {}]   ;;  %s1237_s6 = inlined_call_operand.hbm [shape: f32[1,32], index: 6, kind: input, shape index: {}]   ;;  %s1238_s7 = inlined_call_operand.vmem [shape: f32[2], index: 7, kind: input, shape index: {}]   ;;  %s1239_s8 = inlined_call_operand.hbm [shape: f32[4,32], index: 8, kind: output, shape index: {0}]   ;;  %s1240_s9 = inlined_call_operand.vmem [shape: f32[1,3], index: 9, kind: output, shape index: {1}]  }
   0x1   :  { %16 = vsyncpa [#allocation7], 0 }
   0x2   :  { %17 = vsyncpa [#allocation10], 0 }
   0x3   :  { %18 = vsyncpa [#allocation5], 0  ;;  %s40_s11 = sshll.u32 %s1234_s3, 4  ;;  %s41_s11 = int_to_ptr.hbm [resolvable:$true] %s40_s11 }
   0x4   :  { %19 = vsyncpa [#allocation4], 0  ;;  %s1049_s12 = smov [#allocation6]   ;;  %s61_s16 = sshll.u32 %s1236_s5, 4  ;;  %s62_s16 = int_to_ptr.hbm [resolvable:$true] %s61_s16 }
   0x5   :  { %s42_s13 = sshll.u32 %s1049_s12, 4  ;;  %s1050_s17 = smov [#allocation9]   ;;  %s43_s13 = int_to_ptr.vmem [resolvable:$true] %s42_s13 }
   0x6   :  { %45 = dma.hbm_to_vmem [thread:$0]  %s41_s11, 16, %s43_s13, [#allocation7]  }
   0x7   :  { %s63_s18 = sshll.u32 %s1050_s17, 4  ;;  %s1051_s19 = smov 128   ;;  %s64_s18 = int_to_ptr.vmem [resolvable:$true] %s63_s18 }
   0x8   :  { %s1052_s20 = smov 8   ;;  %s29_s3 = sshll.u32 %s1233_s2, 4  ;;  %s30_s3 = int_to_ptr.hbm [resolvable:$true] %s29_s3 }
   0x9   :  { %69 = dma.hbm_to_vmem [thread:$0]  %s62_s16, 512, %s64_s18, [#allocation10], %s1051_s19, %s1051_s19, %s1052_s20  }
   0xa   :  { %s1053_s23 = smov [#allocation2]   ;;  %s51_s5 = sshll.u32 %s1235_s4, 4  ;;  %s52_s5 = int_to_ptr.hbm [resolvable:$true] %s51_s5 }
   0xb   :  { %s31_s24 = sshll.u32 %s1053_s23, 4  ;;  %s1054_s27 = smov [#allocation8]   ;;  %s32_s24 = int_to_ptr.vmem [resolvable:$true] %s31_s24 }
   0xc   :  { %34 = dma.hbm_to_vmem [thread:$0]  %s30_s3, 128, %s32_s24, [#allocation3]  }
   0xd   :  { %s53_s28 = sshll.u32 %s1054_s27, 4  ;;  %s75_s10 = sshll.u32 %s1237_s6, 4  ;;  %s54_s28 = int_to_ptr.vmem [resolvable:$true] %s53_s28  ;;  %s76_s10 = int_to_ptr.hbm [resolvable:$true] %s75_s10 }
   0xe   :  { %56 = dma.hbm_to_vmem [thread:$0]  %s52_s5, 16, %s54_s28, [#allocation7]  }
   0xf   :  { %s86_s12 = sshll.u32 %s1238_s7, 4  ;;  %s1055_s13 = smov [#allocation11]   ;;  %s87_s12 = int_to_ptr.vmem [resolvable:$true] %s86_s12 }
  0x10   :  { %s77_s14 = sshll.u32 %s1055_s13, 4  ;;  %s1056_s4 = smov [#allocation12]   ;;  %s78_s14 = int_to_ptr.vmem [resolvable:$true] %s77_s14 }
  0x11   :  { %80 = dma.hbm_to_vmem [thread:$0]  %s76_s10, 16, %s78_s14, [#allocation10]  }
  0x12   :  { %89 = dma.vmem_to_smem %s87_s12, 16, %s1056_s4, [#allocation5]  }
  0x13   :  { %1039 = dma.done.wait [#allocation3], 128  }
  0x14   :  { %1040 = vsyncadd [#allocation3], 4294967168 }
  0x15   :  { %1041 = dma.done.wait [#allocation7], 32  }
  0x16   :  { %1042 = vsyncadd [#allocation7], 4294967264 }
  0x17   :  { %1043 = dma.done.wait [#allocation10], 528  }
  0x18   :  { %1044 = vsyncadd [#allocation10], 4294966768 }
  0x19   :  { %1045 = dma.done.wait [#allocation5], 16  }
  0x1a   :  { %1046 = vsyncadd [#allocation5], 4294967280 }
  0x1b   :  { %114 = sfence }
  0x1c   :  { %v1131_v0 = vld [vmem:[%s1232_s1] sm:$0xff]  ;;  %vm128_vm0 = vcmask 261120   ;;  %v118_v4 = vld [vmem:[#allocation6] sm:$0x1]  ;;  %v119_v5 = vld [vmem:[#allocation8] sm:$0x1]  ;;  %v189_v56 = vlaneseq }
  0x1d   :  { %v1136_v1 = vld [vmem:[%s1231_s0] sm:$0xf]  ;;  %807 = vmatpush.xpose.msk.msra.mxu0 %vm128_vm0, %v1131_v0  ;;  %v148_v3 = vmul.f32 %v1131_v0, %v1131_v0  ;;  %v841_v6 = vld [vmem:[#allocation8] ss:$0 sm:$0xff]  ;;  %v840_v7 = vld [vmem:[#allocation6] ss:$0 sm:$0xff] }
  0x1e   :  { %810 = vmatpush.xpose.msk.msra.mxu1 %vm128_vm0, %v1136_v1  ;;  %v312_v2 = vmul.f32 %v1136_v1, %v1136_v1  ;;  %vm258_vm1 = vcmask 257024   ;;  %v257_v10 = vmul.f32 %v841_v6, %v1136_v1  ;;  %v123_v11 = vld [vmem:[#allocation9 + $0x18] sm:$0xff]  ;;  %v1057_v13 = vmov 1.0   ;;  %v122_v15 = vld [vmem:[#allocation9 + $0x10] sm:$0xff]  ;;  %v121_v16 = vld [vmem:[#allocation9 + $0x8] sm:$0xff]  ;;  %s125_s0 = sld [smem:[#allocation12]] }
  0x1f   :  { %815 = vmatpush.xpose.msk.msra.mxu3 %vm128_vm0, %v148_v3  ;;  %v149_v8 = vsel %vm128_vm0, %v148_v3, 0.0  ;;  %v199_v14 = vmul.f32 %v840_v7, %v1131_v0  ;;  %v120_v18 = vld [vmem:[#allocation9] sm:$0xff]  ;;  %s805_s1 = sld [smem:[#allocation12 + $0x1]]  ;;  %vm561_vm2 = vcmask 1043456   ;;  %vm412_vm3 = vcmask 60416   ;;  %s1059_s17 = smov [#allocation13]  }
  0x20   :  { %813 = vmatpush.xpose.msk.msra.mxu2 %vm128_vm0, %v312_v2  ;;  %v313_v9 = vsel %vm258_vm1, %v312_v2, 0.0  ;;  %808 = vmatmul.msk.f32.vlgmr.msra.gmra.mxu0 %vm128_vm0, %v118_v4  ;;  %v259_v12 = vsel %vm258_vm1, %v257_v10, 0.0  ;;  %vm452_vm4 = vcmask 31744   ;;  %v190_v59 = vshrl.u32 %v189_v56, 7  ;;  %s786_s18 = sshll.u32 %s1059_s17, 4  ;;  %s788_s21 = sshll.u32 %s1239_s8, 4  ;;  %s787_s18 = int_to_ptr.vmem [resolvable:$true] %s786_s18  ;;  %s789_s21 = int_to_ptr.hbm [resolvable:$true] %s788_s21 }
  0x21   :  { %817 = vmatpush.xpose.msk.msrb.mxu0 %vm128_vm0, %v1131_v0  ;;  %811 = vmatmul.msk.f32.vlgmr.msra.gmra.mxu1 %vm128_vm0, %v119_v5  ;;  %v200_v17 = vsel %vm128_vm0, %v199_v14, 0.0  ;;  %v1180_v60 = vand.u32 127, %v189_v56  ;;  %vm490_vm14 = vcmask 64512  }
  0x22   :  { %819 = vmatpush.xpose.msk.msrb.mxu1 %vm128_vm0, %v1136_v1  ;;  %150 = vadd.xlane.f32.xlu0 %v149_v8 }
  0x23   :  { %314 = vadd.xlane.f32.xlu1 %v313_v9  ;;  %814 = vmatmul.msk.f32.vlgmr.msra.gmra.mxu2 %vm128_vm0, %v1057_v13  ;;  %vm193_vm5 = vcmp.eq.s32.totalorder %v190_v59, %v1180_v60 }
  0x24   :  { %816 = vmatmul.msk.f32.vlgmr.msra.gmra.mxu3 %vm128_vm0, %v1057_v13  ;;  %260 = vadd.xlane.f32.xlu2 %v259_v12  ;;  %v230_v26 = vstv %s125_s0  ;;  %v1058_v13 = vmov 0.0  }
  0x25   :  { %507 = vmatpush.msrb.mxu2 %v123_v11  ;;  %527 = vmatpush.msrb.mxu3 %v123_v11  ;;  %v289_v27 = vstv %s805_s1  ;;  %v806_v14 = vsel %vm193_vm5, 1.0, %v1058_v13 }
  0x27   :  { %508 = vmatpush.msrb.mxu2 %v122_v15  ;;  %528 = vmatpush.msrb.mxu3 %v122_v15 }
  0x28   :  { %818 = vmatmul.msk.f32.vlgmr.msrb.gmra.mxu0 %vm128_vm0, %v1136_v1 }
  0x29   :  { %509 = vmatpush.msrb.mxu2 %v121_v16  ;;  %820 = vmatmul.msk.f32.vlgmr.msrb.gmra.mxu1 %vm128_vm0, %v1131_v0 }
  0x2a   :  { %529 = vmatpush.msrb.mxu3 %v121_v16 }
  0x2b   :  { %201 = vadd.xlane.f32.xlu1 %v200_v17  ;;  %510 = vmatpush.msrb.mxu2 %v120_v18 }
  0x2c   :  { %821 = vmatmul.msk.f32.vlgmr.msrb.gmra.mxu2 %vm128_vm0, %v1136_v1  ;;  %530 = vmatpush.msrb.mxu3 %v120_v18 }
  0x2d   :  { %822 = vmatmul.msk.f32.vlgmr.msrb.gmra.mxu3 %vm128_vm0, %v1131_v0 }
  0x95   :  { %v1172_v40 = vpop.xlane.xlu0 %150 }
  0x96   :  { %v1170_v19 = vpop.xlane.xlu1 %314 }
  0x97   :  { %v261_v21 = vpop.xlane.xlu2 %260 }
  0x9d   :  { %v225_v22 = vpop.f32.mrf.mxu0 }
  0x9e   :  { %v202_v20 = vpop.xlane.xlu1 %201  ;;  %v284_v23 = vpop.f32.mrf.mxu1  ;;  %v228_v24 = vperm.slane %v225_v22, 0 }
  0x9f   :  { %v287_v25 = vperm.slane %v284_v23, 0  ;;  %v251_v23 = vsub.f32 1.0, %v806_v14 }
  0xa0   :  { %v229_v28 = vsub.f32 %v202_v20, %v228_v24 }
  0xa1   :  { %v288_v29 = vsub.f32 %v261_v21, %v287_v25 }
  0xa2   :  { %v231_v30 = vadd.f32 %v230_v26, %v229_v28 }
  0xa3   :  { %v290_v31 = vadd.f32 %v289_v27, %v288_v29 }
  0xa4   :  { %v809_v32 = vmul.f32 -1.442695, %v231_v30 }
  0xa5   :  { %v812_v33 = vmul.f32 -1.442695, %v290_v31  ;;  %v382_v38 = vpop.f32.mrf.mxu0 }
  0xa6   :  { %v339_v34 = vpop.f32.mrf.mxu2  ;;  %843 = vpow2.f32 %v809_v32  ;;  %v402_v39 = vpop.f32.mrf.mxu1  ;;  %v407_v41 = vmul.f32 2.0, %v382_v38 }
  0xa7   :  { %v362_v35 = vpop.f32.mrf.mxu3  ;;  %v445_v36 = vperm.slane %v339_v34, 0  ;;  %845 = vpow2.f32 %v812_v33  ;;  %v447_v42 = vmul.f32 2.0, %v402_v39 }
  0xa8   :  { %v405_v37 = vperm.slane %v362_v35, 0 }
  0xa9   :  { %v446_v43 = vadd.f32 %v445_v36, %v1172_v40 }
  0xaa   :  { %v406_v44 = vadd.f32 %v405_v37, %v1170_v19 }
  0xab   :  { %v448_v46 = vsub.f32 %v446_v43, %v447_v42 }
  0xac   :  { %v408_v45 = vsub.f32 %v406_v44, %v407_v41  ;;  %v844_v47 = vpop.eup %843  ;;  %v117_v41 = vld [vmem:[#allocation2] sm:$0xff] }
  0xad   :  { %v449_v49 = vmax.f32 %v448_v46, 1e-06  ;;  %v846_v50 = vpop.eup %845  ;;  %v235_v51 = vadd.f32 1.0, %v844_v47  ;;  %v132_v43 = vmul.f32 %v117_v41, %v117_v41 }
  0xae   :  { %v409_v48 = vmax.f32 %v408_v45, 1e-06  ;;  %v294_v53 = vadd.f32 1.0, %v846_v50  ;;  %v127_v50 = vmul.f32 %v117_v41, %v1131_v0 }
  0xaf   :  { %v512_v52 = vpop.f32.mrf.mxu2  ;;  %v450_v55 = vsub.f32 0.0, %v449_v49  ;;  %847 = vrcp.f32 %v235_v51  ;;  %vm241_vm6 = vweird.f32 %v235_v51  ;;  %v247_v7 = vand.u32 2147483648, %v235_v51 }
  0xb0   :  { %v410_v54 = vsub.f32 0.0, %v409_v48  ;;  %824 = vmatpush.msk.msra.mxu1 %vm561_vm2, %v512_v52  ;;  %827 = vmatpush.msk.msra.mxu3 %vm561_vm2, %v512_v52  ;;  %849 = vrcp.f32 %v294_v53  ;;  %v245_v10 = vand.u32 2147483647, %v235_v51  ;;  %v532_v11 = vpop.f32.mrf.mxu3  ;;  %v306_v15 = vand.u32 2147483648, %v294_v53 }
  0xb1   :  { %v1178_v58 = vmul.f32 0.25, %v450_v55  ;;  %553 = vmatpush.msra.mxu0 %v532_v11  ;;  %603 = vmatpush.msra.mxu2 %v532_v11  ;;  %v304_v20 = vand.u32 2147483647, %v294_v53  ;;  %v248_v21 = vor.u32 1.1754944e-38, %v247_v7  ;;  %vm300_vm11 = vweird.f32 %v294_v53 }
  0xb2   :  { %v411_v57 = vmul.f32 0.25, %v410_v54  ;;  %vm246_vm10 = vcmp.eq.f32.partialorder %v245_v10, 8.507059e+37  ;;  %v307_v26 = vor.u32 1.1754944e-38, %v306_v15  ;;  %v133_v47 = vsel %vm128_vm0, %v132_v43, 0.0 }
  0xb3   :  { %v453_v62 = vsel %vm452_vm4, %v1178_v58, -inf  ;;  %vm305_vm13 = vcmp.eq.f32.partialorder %v304_v20, 8.507059e+37 }
  0xb4   :  { %v413_v61 = vsel %vm412_vm3, %v411_v57, -inf  ;;  %454 = vmax.xlane.f32.xlu0 %v453_v62 }
  0xb5   :  { %v414_v63 = vrot.slane %v413_v61, 4  ;;  %v848_v2 = vpop.eup %847 }
  0xb6   :  { %v850_v3 = vpop.eup %849  ;;  %v237_v4 = vmul.f32 %v848_v2, %v235_v51  ;;  %vm242_vm7 = vweird.f32 %v848_v2 }
  0xb7   :  { %v415_v5 = vmax.f32 %v413_v61, %v414_v63  ;;  %v296_v6 = vmul.f32 %v850_v3, %v294_v53  ;;  %vm301_vm8 = vweird.f32 %v850_v3  ;;  %vm243_vm9 = vmor %vm241_vm6, %vm242_vm7  ;;  %v129_v53 = vsel %vm128_vm0, %v127_v50, 0.0 }
  0xb8   :  { %v238_v9 = vsub.f32 1.0, %v237_v4  ;;  %vm302_vm12 = vmor %vm300_vm11, %vm301_vm8  ;;  %vm479_vm8 = vcmask 27648  }
  0xb9   :  { %v416_v8 = vrot.slane %v415_v5, 2  ;;  %v297_v12 = vsub.f32 1.0, %v296_v6 }
  0xba   :  { %v239_v17 = vmul.f32 %v848_v2, %v238_v9 }
  0xbb   :  { %v417_v16 = vmax.f32 %v415_v5, %v416_v8  ;;  %v298_v18 = vmul.f32 %v850_v3, %v297_v12 }
  0xbc   :  { %v240_v24 = vadd.f32 %v848_v2, %v239_v17 }
  0xbd   :  { %v418_v22 = vrot.slane %v417_v16, 1  ;;  %v299_v25 = vadd.f32 %v850_v3, %v298_v18 }
  0xbe   :  { %v244_v28 = vsel %vm243_vm9, %v848_v2, %v240_v24 }
  0xbf   :  { %v419_v27 = vmax.f32 %v417_v16, %v418_v22  ;;  %v303_v29 = vsel %vm302_vm12, %v850_v3, %v299_v25  ;;  %v249_v30 = vsel %vm246_vm10, %v248_v21, %v244_v28 }
  0xc0   :  { %v308_v32 = vsel %vm305_vm13, %v307_v26, %v303_v29  ;;  %v252_v33 = vmul.f32 %v251_v23, %v249_v30 }
  0xc1   :  { %v420_v31 = vsub.f32 %v411_v57, %v419_v27  ;;  %v310_v34 = vmul.f32 %v308_v32, %v251_v23 }
  0xc2   :  { %v253_v36 = vadd.f32 %v806_v14, %v252_v33 }
  0xc3   :  { %v421_v35 = vmul.f32 1.442695, %v420_v31  ;;  %v311_v37 = vadd.f32 %v806_v14, %v310_v34 }
  0xc4   :  { %v478_v38 = vadd.f32 %v806_v14, %v253_v36 }
  0xc5   :  { %851 = vpow2.f32 %v421_v35  ;;  %v477_v39 = vadd.f32 %v806_v14, %v311_v37 }
  0xc6   :  { %v491_v42 = vsel %vm490_vm14, %v478_v38, 0.0  ;;  %826 = vmatmul.msk.f32.vlgmr.msra.gmra.mxu2 %vm490_vm14, %v478_v38 }
  0xc7   :  { %825 = vmatmul.msk.f32.vlgmr.msra.gmra.mxu1 %vm452_vm4, %v477_v39  ;;  %492 = vadd.xlane.f32.xlu1 %v491_v42  ;;  %v480_v11 = vsel %vm479_vm8, %v477_v39, 0.0 }
  0xcb   :  { %v852_v44 = vpop.eup %851 }
  0xcc   :  { %v423_v45 = vsel %vm412_vm3, %v852_v44, 0.0 }
  0xcd   :  { %v424_v46 = vrot.slane %v423_v45, 4 }
  0xcf   :  { %v425_v48 = vadd.f32 %v424_v46, %v423_v45  ;;  %134 = vadd.xlane.f32.xlu1 %v133_v47  ;;  %v842_v46 = vld [vmem:[#allocation11] ss:$0 sm:$0xff] }
  0xd1   :  { %v426_v49 = vrot.slane %v425_v48, 2 }
  0xd3   :  { %v427_v51 = vadd.f32 %v426_v49, %v425_v48 }
  0xd5   :  { %v428_v52 = vrot.slane %v427_v51, 1 }
  0xd7   :  { %v429_v54 = vadd.f32 %v428_v52, %v427_v51  ;;  %130 = vadd.xlane.f32.xlu1 %v129_v53 }
  0xd9   :  { %853 = vrcp.f32 %v429_v54  ;;  %v441_v57 = vand.u32 2147483648, %v429_v54  ;;  %vm435_vm15 = vweird.f32 %v429_v54  ;;  %v439_v61 = vand.u32 2147483647, %v429_v54 }
  0xdb   :  { %v442_v63 = vor.u32 1.1754944e-38, %v441_v57  ;;  %vm440_vm7 = vcmp.eq.f32.partialorder %v439_v61, 8.507059e+37 }
  0xdf   :  { %v854_v55 = vpop.eup %853 }
  0xe0   :  { %v431_v56 = vmul.f32 %v854_v55, %v429_v54  ;;  %vm436_vm5 = vweird.f32 %v854_v55 }
  0xe1   :  { %vm437_vm6 = vmor %vm435_vm15, %vm436_vm5 }
  0xe2   :  { %v432_v59 = vsub.f32 1.0, %v431_v56 }
  0xe4   :  { %v433_v62 = vmul.f32 %v854_v55, %v432_v59 }
  0xe6   :  { %v434_v2 = vadd.f32 %v854_v55, %v433_v62 }
  0xe8   :  { %v438_v3 = vsel %vm437_vm6, %v854_v55, %v434_v2 }
  0xe9   :  { %v443_v4 = vsel %vm440_vm7, %v442_v63, %v438_v3 }
  0xea   :  { %v444_v5 = vmul.f32 %v852_v44, %v443_v4 }
  0xec   :  { %823 = vmatmul.msk.f32.vlgmr.msra.gmra.mxu0 %vm490_vm14, %v444_v5  ;;  %v483_v25 = vsel %vm412_vm3, %v444_v5, 0.0 }
 0x127   :  { %v455_v6 = vpop.xlane.xlu0 %454 }
 0x128   :  { %v456_v7 = vsub.f32 %v1178_v58, %v455_v6 }
 0x12a   :  { %v457_v8 = vmul.f32 1.442695, %v456_v7 }
 0x12c   :  { %855 = vpow2.f32 %v457_v8 }
 0x132   :  { %v856_v9 = vpop.eup %855 }
 0x133   :  { %v459_v10 = vsel %vm452_vm4, %v856_v9, 0.0 }
 0x134   :  { %460 = vadd.xlane.f32.xlu2 %v459_v10 }
 0x13a   :  { %v493_v26 = vpop.xlane.xlu1 %492 }
 0x13c   :  { %481 = vadd.xlane.f32.xlu2 %v480_v11 }
 0x144   :  { %v582_v57 = vpop.f32.mrf.mxu1 }
 0x149   :  { %v605_v42 = vpop.f32.mrf.mxu2 }
 0x169   :  { %v555_v55 = vpop.f32.mrf.mxu0 }
 0x16a   :  { %v583_v61 = vadd.f32 %v582_v57, %v555_v55 }
 0x1a7   :  { %v461_v12 = vpop.xlane.xlu2 %460 }
 0x1a8   :  { %857 = vrcp.f32 %v461_v12  ;;  %v473_v16 = vand.u32 2147483648, %v461_v12  ;;  %v471_v18 = vand.u32 2147483647, %v461_v12  ;;  %vm467_vm10 = vweird.f32 %v461_v12 }
 0x1aa   :  { %v474_v58 = vor.u32 1.1754944e-38, %v473_v16  ;;  %vm472_vm12 = vcmp.eq.f32.partialorder %v471_v18, 8.507059e+37 }
 0x1ae   :  { %v858_v13 = vpop.eup %857 }
 0x1af   :  { %v463_v14 = vmul.f32 %v858_v13, %v461_v12  ;;  %vm468_vm9 = vweird.f32 %v858_v13  ;;  %v482_v29 = vpop.xlane.xlu2 %481 }
 0x1b0   :  { %vm469_vm11 = vmor %vm467_vm10, %vm468_vm9  ;;  %vm161_vm9 = vcmp.eq.f32.partialorder %v1172_v40, 0.0  ;;  %vm740_vm10 = vcmp.eq.f32.partialorder %v1170_v19, inf }
 0x1b1   :  { %v464_v15 = vsub.f32 1.0, %v463_v14 }
 0x1b3   :  { %v465_v17 = vmul.f32 %v858_v13, %v464_v15 }
 0x1b5   :  { %v466_v20 = vadd.f32 %v858_v13, %v465_v17 }
 0x1b7   :  { %v470_v21 = vsel %vm469_vm11, %v858_v13, %v466_v20 }
 0x1b8   :  { %v475_v22 = vsel %vm472_vm12, %v474_v58, %v470_v21 }
 0x1b9   :  { %v476_v23 = vmul.f32 %v856_v9, %v475_v22 }
 0x1bb   :  { %828 = vmatmul.msk.f32.vlgmr.msra.gmra.mxu3 %vm452_vm4, %v476_v23  ;;  %v487_v24 = vsel %vm452_vm4, %v476_v23, 0.0 }
 0x1bc   :  { %488 = vadd.xlane.f32.xlu0 %v487_v24 }
 0x1c4   :  { %484 = vadd.xlane.f32.xlu0 %v483_v25 }
 0x22f   :  { %v489_v27 = vpop.xlane.xlu0 %488 }
 0x230   :  { %v494_v28 = vadd.f32 %v493_v26, %v489_v27 }
 0x232   :  { %859 = vrcp.f32 %v494_v28  ;;  %v662_v35 = vand.u32 2147483648, %v494_v28  ;;  %v660_v37 = vand.u32 2147483647, %v494_v28  ;;  %vm656_vm4 = vweird.f32 %v494_v28 }
 0x234   :  { %v663_v43 = vor.u32 1.1754944e-38, %v662_v35  ;;  %vm661_vm14 = vcmp.eq.f32.partialorder %v660_v37, 8.507059e+37 }
 0x237   :  { %v485_v30 = vpop.xlane.xlu0 %484 }
 0x238   :  { %v860_v31 = vpop.eup %859  ;;  %v486_v32 = vadd.f32 %v485_v30, %v482_v29  ;;  %v162_v29 = vand.u32 2147483648, %v1172_v40 }
 0x239   :  { %v652_v33 = vmul.f32 %v860_v31, %v494_v28  ;;  %vm657_vm13 = vweird.f32 %v860_v31 }
 0x23a   :  { %861 = vrcp.f32 %v486_v32  ;;  %vm658_vm3 = vmor %vm656_vm4, %vm657_vm13  ;;  %v642_v51 = vand.u32 2147483648, %v486_v32  ;;  %v640_v53 = vand.u32 2147483647, %v486_v32  ;;  %vm636_vm5 = vweird.f32 %v486_v32 }
 0x23b   :  { %v653_v34 = vsub.f32 1.0, %v652_v33  ;;  %vm742_vm13 = vcmp.eq.f32.partialorder %v1170_v19, 0.0 }
 0x23c   :  { %v643_v59 = vor.u32 1.1754944e-38, %v642_v51  ;;  %vm641_vm7 = vcmp.eq.f32.partialorder %v640_v53, 8.507059e+37 }
 0x23d   :  { %v654_v36 = vmul.f32 %v860_v31, %v653_v34 }
 0x23e   :  { %v628_v38 = vpop.f32.mrf.mxu3 }
 0x23f   :  { %v655_v39 = vadd.f32 %v860_v31, %v654_v36  ;;  %v629_v45 = vadd.f32 %v628_v38, %v605_v42 }
 0x240   :  { %v862_v41 = vpop.eup %861 }
 0x241   :  { %v632_v44 = vmul.f32 %v862_v41, %v486_v32  ;;  %v659_v47 = vsel %vm658_vm3, %v860_v31, %v655_v39  ;;  %vm637_vm15 = vweird.f32 %v862_v41 }
 0x242   :  { %v664_v48 = vsel %vm661_vm14, %v663_v43, %v659_v47  ;;  %vm638_vm6 = vmor %vm636_vm5, %vm637_vm15 }
 0x243   :  { %v633_v49 = vsub.f32 1.0, %v632_v44  ;;  %v665_v50 = vmul.f32 %v664_v48, %v629_v45 }
 0x245   :  { %v634_v52 = vmul.f32 %v862_v41, %v633_v49  ;;  %v666_v54 = vadd.f32 %v842_v46, %v665_v50 }
 0x247   :  { %v635_v56 = vadd.f32 %v862_v41, %v634_v52  ;;  %863 = vtanh.f32 %v666_v54 }
 0x249   :  { %v639_v62 = vsel %vm638_vm6, %v862_v41, %v635_v56 }
 0x24a   :  { %v644_v63 = vsel %vm641_vm7, %v643_v59, %v639_v62 }
 0x24b   :  { %v645_v2 = vmul.f32 %v644_v63, %v583_v61 }
 0x24d   :  { %v864_v3 = vpop.eup %863  ;;  %v649_v4 = vadd.f32 %v842_v46, %v645_v2 }
 0x24e   :  { %v673_v5 = vmul.f32 %v864_v3, %v864_v3  ;;  %v669_v7 = vmul.f32 %v864_v3, %v1131_v0  ;;  %v135_v0 = vpop.xlane.xlu1 %134 }
 0x24f   :  { %865 = vtanh.f32 %v649_v4  ;;  %v146_v27 = vand.u32 2147483648, %v135_v0  ;;  %vm145_vm8 = vcmp.eq.f32.partialorder %v135_v0, 0.0 }
 0x250   :  { %v674_v6 = vsel %vm128_vm0, %v673_v5, 0.0  ;;  %v670_v10 = vsel %vm128_vm0, %v669_v7, 0.0  ;;  %867 = vrsqrt.f32 %v135_v0  ;;  %vm143_vm0 = vcmp.eq.f32.partialorder %v135_v0, inf }
 0x251   :  { %675 = vadd.xlane.f32.xlu2 %v674_v6  ;;  %869 = vrsqrt.f32 %v1172_v40  ;;  %v743_v6 = vand.u32 2147483648, %v1170_v19 }
 0x252   :  { %871 = vrsqrt.f32 %v1170_v19 }
 0x255   :  { %v866_v8 = vpop.eup %865 }
 0x256   :  { %668 = vst.msk [vmem:[#allocation13] sm:$0xf] %vm258_vm1, %v866_v8  ;;  %v717_v9 = vmul.f32 %v866_v8, %v866_v8  ;;  %v713_v12 = vmul.f32 %v866_v8, %v1136_v1  ;;  %v868_v14 = vpop.eup %867 }
 0x257   :  { %791 = dma.vmem_to_hbm [thread:$0]  %s787_s18, 64, %s789_s21, [#allocation4]   ;;  %v870_v15 = vpop.eup %869  ;;  %v137_v16 = vmul.f32 %v868_v14, %v135_v0 }
 0x258   :  { %v718_v11 = vsel %vm258_vm1, %v717_v9, 0.0  ;;  %v714_v13 = vsel %vm258_vm1, %v713_v12, 0.0  ;;  %v153_v1 = vmul.f32 %v870_v15, %v1172_v40  ;;  %vm159_vm1 = vcmp.eq.f32.partialorder %v1172_v40, inf  ;;  %v872_v34 = vpop.eup %871 }
 0x259   :  { %671 = vadd.xlane.f32.xlu2 %v670_v10  ;;  %719 = vadd.xlane.f32.xlu0 %v718_v11  ;;  %v138_v17 = vmul.f32 %v868_v14, %v137_v16  ;;  %v734_v36 = vmul.f32 %v872_v34, %v1170_v19 }
 0x25a   :  { %v154_v18 = vmul.f32 %v870_v15, %v153_v1 }
 0x25b   :  { %v139_v20 = vmul.f32 0.5, %v138_v17  ;;  %v735_v39 = vmul.f32 %v872_v34, %v734_v36 }
 0x25c   :  { %v155_v58 = vmul.f32 0.5, %v154_v18 }
 0x25d   :  { %v140_v21 = vsub.f32 1.5, %v139_v20  ;;  %v736_v42 = vmul.f32 0.5, %v735_v39  ;;  %v131_v20 = vpop.xlane.xlu1 %130 }
 0x25e   :  { %v156_v22 = vsub.f32 1.5, %v155_v58 }
 0x25f   :  { %v141_v23 = vmul.f32 %v868_v14, %v140_v21 }
 0x260   :  { %v157_v24 = vmul.f32 %v870_v15, %v156_v22 }
 0x261   :  { %715 = vadd.xlane.f32.xlu0 %v714_v13  ;;  %v142_v25 = vmul.f32 %v141_v23, %v135_v0 }
 0x262   :  { %v158_v26 = vmul.f32 %v157_v24, %v1172_v40 }
 0x263   :  { %v144_v28 = vsel %vm143_vm0, %v135_v0, %v142_v25 }
 0x264   :  { %v160_v30 = vsel %vm159_vm1, %v1172_v40, %v158_v26  ;;  %v147_v31 = vsel %vm145_vm8, %v146_v27, %v144_v28  ;;  %v737_v40 = vsub.f32 1.5, %v736_v42 }
 0x265   :  { %v163_v32 = vsel %vm161_vm9, %v162_v29, %v160_v30  ;;  %v164_v33 = vmax.f32 %v147_v31, 1e-08 }
 0x266   :  { %v165_v35 = vmax.f32 %v163_v32, 1e-08  ;;  %v738_v51 = vmul.f32 %v872_v34, %v737_v40 }
 0x268   :  { %v166_v37 = vmul.f32 %v165_v35, %v164_v33  ;;  %v739_v57 = vmul.f32 %v738_v51, %v1170_v19 }
 0x26a   :  { %v741_v5 = vsel %vm740_vm10, %v1170_v19, %v739_v57  ;;  %v178_v10 = vand.u32 2147483648, %v166_v37  ;;  %vm172_vm3 = vweird.f32 %v166_v37  ;;  %v176_v11 = vand.u32 2147483647, %v166_v37 }
 0x26b   :  { %v744_v0 = vsel %vm742_vm13, %v743_v6, %v741_v5  ;;  %vm773_vm13 = vcmp.eq.s32.totalorder %v1180_v60, 1 }
 0x26c   :  { %v179_v16 = vor.u32 1.1754944e-38, %v178_v10  ;;  %vm177_vm6 = vcmp.eq.f32.partialorder %v176_v11, 8.507059e+37  ;;  %v746_v17 = vmax.f32 %v744_v0, 1e-08 }
 0x2c4   :  { %v676_v38 = vpop.xlane.xlu2 %675 }
 0x2c5   :  { %873 = vrsqrt.f32 %v676_v38  ;;  %vm684_vm11 = vcmp.eq.f32.partialorder %v676_v38, inf  ;;  %v687_v59 = vand.u32 2147483648, %v676_v38  ;;  %vm686_vm12 = vcmp.eq.f32.partialorder %v676_v38, 0.0 }
 0x2c6   :  { %875 = vrcp.f32 %v166_v37 }
 0x2cb   :  { %v874_v41 = vpop.eup %873 }
 0x2cc   :  { %v678_v43 = vmul.f32 %v874_v41, %v676_v38  ;;  %v720_v44 = vpop.xlane.xlu0 %719  ;;  %v876_v45 = vpop.eup %875 }
 0x2cd   :  { %877 = vrsqrt.f32 %v720_v44  ;;  %v168_v47 = vmul.f32 %v876_v45, %v166_v37  ;;  %vm173_vm4 = vweird.f32 %v876_v45  ;;  %vm728_vm15 = vcmp.eq.f32.partialorder %v720_v44, inf  ;;  %v672_v36 = vpop.xlane.xlu2 %671 }
 0x2ce   :  { %v679_v46 = vmul.f32 %v874_v41, %v678_v43  ;;  %vm174_vm14 = vmor %vm172_vm3, %vm173_vm4  ;;  %v731_v13 = vand.u32 2147483648, %v720_v44  ;;  %vm730_vm5 = vcmp.eq.f32.partialorder %v720_v44, 0.0  ;;  %vm771_vm4 = vcmp.eq.s32.totalorder %v1180_v60, 0 }
 0x2cf   :  { %v169_v52 = vsub.f32 1.0, %v168_v47  ;;  %vm776_vm3 = vcmp.eq.s32.totalorder %v1180_v60, 2 }
 0x2d0   :  { %v680_v48 = vmul.f32 0.5, %v679_v46 }
 0x2d1   :  { %v170_v61 = vmul.f32 %v876_v45, %v169_v52 }
 0x2d2   :  { %v681_v49 = vsub.f32 1.5, %v680_v48 }
 0x2d3   :  { %v878_v50 = vpop.eup %877  ;;  %v171_v7 = vadd.f32 %v876_v45, %v170_v61 }
 0x2d4   :  { %v682_v53 = vmul.f32 %v874_v41, %v681_v49  ;;  %v722_v54 = vmul.f32 %v878_v50, %v720_v44  ;;  %v716_v51 = vpop.xlane.xlu0 %715 }
 0x2d5   :  { %v175_v14 = vsel %vm174_vm14, %v876_v45, %v171_v7 }
 0x2d6   :  { %v683_v55 = vmul.f32 %v682_v53, %v676_v38  ;;  %v723_v56 = vmul.f32 %v878_v50, %v722_v54  ;;  %v180_v18 = vsel %vm177_vm6, %v179_v16, %v175_v14 }
 0x2d7   :  { %v181_v23 = vmul.f32 %v180_v18, %v131_v20 }
 0x2d8   :  { %v685_v62 = vsel %vm684_vm11, %v676_v38, %v683_v55  ;;  %v724_v63 = vmul.f32 0.5, %v723_v56 }
 0x2d9   :  { %v688_v2 = vsel %vm686_vm12, %v687_v59, %v685_v62  ;;  %v182_v28 = vrot.slane %v181_v23, 4 }
 0x2da   :  { %v689_v3 = vmax.f32 %v688_v2, 1e-08  ;;  %v725_v4 = vsub.f32 1.5, %v724_v63 }
 0x2db   :  { %v183_v34 = vadd.f32 %v182_v28, %v181_v23 }
 0x2dc   :  { %v726_v8 = vmul.f32 %v878_v50, %v725_v4  ;;  %v690_v9 = vmul.f32 %v689_v3, %v165_v35 }
 0x2de   :  { %v727_v12 = vmul.f32 %v726_v8, %v720_v44  ;;  %879 = vrcp.f32 %v690_v9  ;;  %v702_v25 = vand.u32 2147483648, %v690_v9  ;;  %v700_v27 = vand.u32 2147483647, %v690_v9 }
 0x2df   :  { %vm696_vm0 = vweird.f32 %v690_v9 }
 0x2e0   :  { %v729_v15 = vsel %vm728_vm15, %v720_v44, %v727_v12  ;;  %v703_v31 = vor.u32 1.1754944e-38, %v702_v25  ;;  %vm701_vm8 = vcmp.eq.f32.partialorder %v700_v27, 8.507059e+37  ;;  %v184_v44 = vrot.slane %v183_v34, 2 }
 0x2e1   :  { %v732_v1 = vsel %vm730_vm5, %v731_v13, %v729_v15 }
 0x2e2   :  { %v745_v19 = vmax.f32 %v732_v1, 1e-08  ;;  %v185_v49 = vadd.f32 %v184_v44, %v183_v34 }
 0x2e4   :  { %v880_v58 = vpop.eup %879  ;;  %v747_v21 = vmul.f32 %v746_v17, %v745_v19  ;;  %v186_v56 = vrot.slane %v185_v49, 1 }
 0x2e5   :  { %v692_v22 = vmul.f32 %v880_v58, %v690_v9  ;;  %vm697_vm7 = vweird.f32 %v880_v58 }
 0x2e6   :  { %881 = vrcp.f32 %v747_v21  ;;  %vm698_vm1 = vmor %vm696_vm0, %vm697_vm7  ;;  %v759_v39 = vand.u32 2147483648, %v747_v21  ;;  %v757_v43 = vand.u32 2147483647, %v747_v21  ;;  %vm753_vm10 = vweird.f32 %v747_v21 }
 0x2e7   :  { %v693_v24 = vsub.f32 1.0, %v692_v22  ;;  %v187_v62 = vadd.f32 %v186_v56, %v185_v49 }
 0x2e8   :  { %v760_v40 = vor.u32 1.1754944e-38, %v759_v39  ;;  %vm758_vm12 = vcmp.eq.f32.partialorder %v757_v43, 8.507059e+37 }
 0x2e9   :  { %v694_v26 = vmul.f32 %v880_v58, %v693_v24  ;;  %v188_v4 = vmul.f32 0.125, %v187_v62 }
 0x2eb   :  { %v695_v29 = vadd.f32 %v880_v58, %v694_v26  ;;  %v772_v8 = vsel %vm771_vm4, %v188_v4, 0.0 }
 0x2ec   :  { %v882_v30 = vpop.eup %881 }
 0x2ed   :  { %v699_v32 = vsel %vm698_vm1, %v880_v58, %v695_v29  ;;  %v749_v33 = vmul.f32 %v882_v30, %v747_v21  ;;  %vm754_vm9 = vweird.f32 %v882_v30 }
 0x2ee   :  { %v704_v35 = vsel %vm701_vm8, %v703_v31, %v699_v32  ;;  %vm755_vm11 = vmor %vm753_vm10, %vm754_vm9 }
 0x2ef   :  { %v705_v37 = vmul.f32 %v704_v35, %v672_v36  ;;  %v750_v38 = vsub.f32 1.0, %v749_v33 }
 0x2f1   :  { %v706_v41 = vrot.slane %v705_v37, 4  ;;  %v751_v42 = vmul.f32 %v882_v30, %v750_v38 }
 0x2f3   :  { %v707_v45 = vadd.f32 %v706_v41, %v705_v37  ;;  %v752_v46 = vadd.f32 %v882_v30, %v751_v42 }
 0x2f5   :  { %v708_v47 = vrot.slane %v707_v45, 2  ;;  %v756_v48 = vsel %vm755_vm11, %v882_v30, %v752_v46 }
 0x2f6   :  { %v761_v50 = vsel %vm758_vm12, %v760_v40, %v756_v48 }
 0x2f7   :  { %v709_v52 = vadd.f32 %v708_v47, %v707_v45  ;;  %v762_v53 = vmul.f32 %v761_v50, %v716_v51 }
 0x2f9   :  { %v710_v54 = vrot.slane %v709_v52, 1  ;;  %v763_v55 = vsel %vm561_vm2, %v762_v53, 0.0  ;;  %vm779_vm2 = vcmask 16384  }
 0x2fa   :  { %v764_v57 = vrot.slane %v763_v55, 4 }
 0x2fb   :  { %v711_v59 = vadd.f32 %v710_v54, %v709_v52 }
 0x2fc   :  { %v765_v61 = vadd.f32 %v764_v57, %v763_v55 }
 0x2fd   :  { %v712_v2 = vmul.f32 0.125, %v711_v59 }
 0x2fe   :  { %v766_v63 = vrot.slane %v765_v61, 2 }
 0x2ff   :  { %v774_v6 = vsel %vm773_vm13, %v712_v2, 0.0 }
 0x300   :  { %v767_v3 = vadd.f32 %v766_v63, %v765_v61  ;;  %v775_v10 = vadd.f32 %v774_v6, %v772_v8 }
 0x302   :  { %v768_v5 = vrot.slane %v767_v3, 1 }
 0x304   :  { %v769_v7 = vadd.f32 %v768_v5, %v767_v3 }
 0x306   :  { %v770_v9 = vmul.f32 0.25, %v769_v7 }
 0x308   :  { %v777_v11 = vsel %vm776_vm3, %v770_v9, 0.0 }
 0x309   :  { %v778_v12 = vadd.f32 %v777_v11, %v775_v10 }
 0x30b   :  { %780 = vst.msk [vmem:[%s1240_s9] sm:$0x1] %vm779_vm2, %v778_v12 }
 0x30c   :  { %1047 = dma.done.wait [#allocation4], 64  }
 0x30d   :  { %1048 = vsyncadd [#allocation4], 4294967232 }
 0x30e   :  { %800 = vsyncpa [#allocation3], 1 }
 0x30f   :  { %801 = vsyncpa [#allocation7], 1 }
 0x310   :  { %802 = vsyncpa [#allocation10], 1 }
 0x311   :  { %803 = vsyncpa [#allocation4], 1 }
 0x312   :  { %804 = vsyncpa [#allocation5], 1 }

</bundles_post_ra>
